<compile_context>
chip_gen: v7x
topology: tpu7x:2x2x1
jax: 0.10.0
libtpu: 0.0.40
codegen_flags: <defaults>
</compile_context>

<pallas_src>
import functools

import jax
import jax.numpy as jnp
from jax.experimental import pallas as pl
from jax.experimental.pallas import tpu as pltpu

_LANES = 128


def _layernorm_kernel(x_ref, gamma_ref, beta_ref, o_ref, *, eps, inv_hidden,
                      hidden_valid):
    # x_ref: (tile_rows, hidden_p); gamma_ref/beta_ref: (1, hidden_p)
    x = x_ref[...].astype(jnp.float32)
    hidden_p = x.shape[-1]

    # Mean over the true hidden width. Padded lanes are zero in the input, so
    # they contribute nothing to the sum; divide by the true hidden size.
    u = jnp.sum(x, axis=-1, keepdims=True) * inv_hidden
    xc = x - u

    if hidden_valid != hidden_p:
        # Padded lanes hold (0 - u) after centering; mask them out of the
        # variance reduction. (>=2-D iota as required on TPU.)
        lane = jax.lax.broadcasted_iota(jnp.int32, (1, hidden_p), 1)
        xc_valid = jnp.where(lane < hidden_valid, xc, 0.0)
    else:
        xc_valid = xc

    s = jnp.sum(xc_valid * xc_valid, axis=-1, keepdims=True) * inv_hidden
    inv = jax.lax.rsqrt(s + eps)
    y = xc * inv
    y = gamma_ref[...].astype(jnp.float32) * y + beta_ref[...].astype(jnp.float32)
    o_ref[...] = y.astype(o_ref.dtype)


def _sublane_pack(dtype) -> int:
    # Sub-32-bit dtypes pack along sublanes: f32 -> 8, bf16 -> 16, 8-bit -> 32.
    itemsize = jnp.dtype(dtype).itemsize
    return max(8, 32 // max(itemsize, 1))


def _pick_tile_rows(rows, hidden_p, dtype,
                    target_f32_block_bytes=2 * 1024 * 1024) -> int:
    """Pick tile_rows so one tile's *f32-expanded* footprint (the in-kernel
    working copies) is ~2 MiB, aligned to the dtype's sublane packing."""
    pack = _sublane_pack(dtype)
    tr = max(pack, target_f32_block_bytes // max(hidden_p * 4, 1))
    tr = (tr // pack) * pack
    rows_rounded = ((rows + pack - 1) // pack) * pack
    tr = min(tr, rows_rounded)
    return int(max(tr, pack))


def _pick_vmem_limit() -> int:
    """Generation-aware scoped-VMEM limit: ~9/16 of physical VMEM, capped at
    48 MiB. -> ~36 MiB on v7x (64 MiB/TC), 48 MiB on v5e/v6e (128 MiB)."""
    try:
        cap = int(pltpu.get_tpu_info().vmem_capacity_bytes)
    except Exception:
        cap = 64 * 1024 * 1024  # conservative (v7x per-TC) fallback
    return min(48 * 1024 * 1024, (cap * 9) // 16)


def layer_norm(x, gamma, beta, eps=1e-12, tile_rows=None):
    """x: (..., hidden). Returns gamma * (x - mean)/sqrt(var + eps) + beta."""
    orig_shape = x.shape
    hidden = orig_shape[-1]
    x2 = x.reshape(-1, hidden)
    rows = x2.shape[0]

    gamma2 = gamma.reshape(1, hidden)
    beta2 = beta.reshape(1, hidden)

    # Lane-dense stores: pad hidden up to a multiple of 128 lanes if needed.
    hidden_p = ((hidden + _LANES - 1) // _LANES) * _LANES
    if hidden_p != hidden:
        pad = hidden_p - hidden
        x2 = jnp.pad(x2, ((0, 0), (0, pad)))
        gamma2 = jnp.pad(gamma2, ((0, 0), (0, pad)))
        beta2 = jnp.pad(beta2, ((0, 0), (0, pad)))

    if tile_rows is None:
        tile_rows = _pick_tile_rows(rows, hidden_p, x2.dtype)

    # Ragged last row-block is masked by Pallas; rows are independent so the
    # garbage rows never affect valid output (see header comment).
    grid = (pl.cdiv(rows, tile_rows),)

    kernel = functools.partial(
        _layernorm_kernel,
        eps=float(eps),
        inv_hidden=1.0 / hidden,
        hidden_valid=hidden,
    )

    out = pl.pallas_call(
        kernel,
        out_shape=jax.ShapeDtypeStruct((rows, hidden_p), x.dtype),
        grid_spec=pltpu.PrefetchScalarGridSpec(
            num_scalar_prefetch=0,
            grid=grid,
            in_specs=[
                pl.BlockSpec((tile_rows, hidden_p), lambda i: (i, 0)),
                pl.BlockSpec((1, hidden_p), lambda i: (0, 0)),
                pl.BlockSpec((1, hidden_p), lambda i: (0, 0)),
            ],
            out_specs=pl.BlockSpec((tile_rows, hidden_p), lambda i: (i, 0)),
        ),
        compiler_params=pltpu.CompilerParams(
            dimension_semantics=("parallel",),
            vmem_limit_bytes=_pick_vmem_limit(),
        ),
    )(x2, gamma2, beta2)

    if hidden_p != hidden:
        out = out[:, :hidden]
    return out.reshape(orig_shape)


if __name__ == "__main__":
    key = jax.random.PRNGKey(0)
    batch, seq, hidden = 2, 8, 32

    x = jax.random.normal(key, (batch, seq, hidden), dtype=jnp.float32)

    # Deterministic parameter init matching nn.Parameter(torch.ones/zeros(hidden))
    gamma = jnp.ones((hidden,), dtype=jnp.float32)
    beta = jnp.zeros((hidden,), dtype=jnp.float32)

    y = layer_norm(x, gamma, beta, eps=1e-12)
    y = jax.block_until_ready(y)

    # Reference check (plain JAX, same math as the PyTorch module)
    u = jnp.mean(x, axis=-1, keepdims=True)
    s = jnp.mean((x - u) ** 2, axis=-1, keepdims=True)
    ref = gamma * ((x - u) / jnp.sqrt(s + 1e-12)) + beta
    assert jnp.allclose(y, ref, atol=1e-5, rtol=1e-5), "mismatch vs reference"

    print("KERNEL_OK")
</pallas_src>

<mosaic_0001>
module attributes {stable_mosaic.version = 11 : i64} {
  func.func @_layernorm_kernel(%arg0: i32, %arg1: memref<16x128xf32, #tpu.memory_space<vmem>>, %arg2: memref<1x128xf32, #tpu.memory_space<vmem>>, %arg3: memref<1x128xf32, #tpu.memory_space<vmem>>, %arg4: memref<16x128xf32, #tpu.memory_space<vmem>>) attributes {dimension_semantics = [#tpu.dimension_semantics<parallel>], iteration_bounds = array<i64: 1>, scalar_prefetch = 0 : i64, scratch_operands = 0 : i64, tpu.core_type = #tpu.core_type<tc>, window_params = [{transform_indices = @transform_0, window_bounds = array<i64: 16, 128>}, {pipeline_mode = #tpu.pipeline_mode<synchronous>, transform_indices = @transform_1, window_bounds = array<i64: 1, 128>}, {pipeline_mode = #tpu.pipeline_mode<synchronous>, transform_indices = @transform_2, window_bounds = array<i64: 1, 128>}, {transform_indices = @transform_3, window_bounds = array<i64: 16, 128>}]} {
    %c0 = arith.constant 0 : index
    %c0_0 = arith.constant 0 : index
    %0 = vector.load %arg1[%c0, %c0_0] : memref<16x128xf32, #tpu.memory_space<vmem>>, vector<16x128xf32>
    %cst = arith.constant dense<0.000000e+00> : vector<16xf32>
    %1 = vector.multi_reduction <add>, %0, %cst [1] : vector<16x128xf32> to vector<16xf32>
    %2 = vector.shape_cast %1 : vector<16xf32> to vector<16x1xf32>
    %cst_1 = arith.constant 3.125000e-02 : f32
    %3 = vector.broadcast %cst_1 : f32 to vector<16x1xf32>
    %4 = arith.mulf %2, %3 : vector<16x1xf32>
    %5 = vector.broadcast %4 : vector<16x1xf32> to vector<16x128xf32>
    %6 = arith.subf %0, %5 : vector<16x128xf32>
    %7 = tpu.iota {dimensions = array<i32: 1>} : vector<1x128xi32>
    %c32_i32 = arith.constant 32 : i32
    %8 = vector.broadcast %c32_i32 : i32 to vector<1x128xi32>
    %9 = arith.cmpi slt, %7, %8 : vector<1x128xi32>
    %cst_2 = arith.constant 0.000000e+00 : f32
    %10 = vector.shape_cast %9 : vector<1x128xi1> to vector<1x128xi1>
    %11 = vector.broadcast %10 : vector<1x128xi1> to vector<16x128xi1>
    %12 = vector.broadcast %cst_2 : f32 to vector<16x128xf32>
    %13 = arith.select %11, %6, %12 : vector<16x128xi1>, vector<16x128xf32>
    %14 = arith.mulf %13, %13 : vector<16x128xf32>
    %cst_3 = arith.constant dense<0.000000e+00> : vector<16xf32>
    %15 = vector.multi_reduction <add>, %14, %cst_3 [1] : vector<16x128xf32> to vector<16xf32>
    %16 = vector.shape_cast %15 : vector<16xf32> to vector<16x1xf32>
    %cst_4 = arith.constant 3.125000e-02 : f32
    %17 = vector.broadcast %cst_4 : f32 to vector<16x1xf32>
    %18 = arith.mulf %16, %17 : vector<16x1xf32>
    %cst_5 = arith.constant 9.99999996E-13 : f32
    %19 = vector.broadcast %cst_5 : f32 to vector<16x1xf32>
    %20 = arith.addf %18, %19 : vector<16x1xf32>
    %21 = math.rsqrt %20 : vector<16x1xf32>
    %22 = vector.broadcast %21 : vector<16x1xf32> to vector<16x128xf32>
    %23 = arith.mulf %6, %22 : vector<16x128xf32>
    %c0_6 = arith.constant 0 : index
    %c0_7 = arith.constant 0 : index
    %24 = vector.load %arg2[%c0_6, %c0_7] : memref<1x128xf32, #tpu.memory_space<vmem>>, vector<1x128xf32>
    %25 = vector.broadcast %24 : vector<1x128xf32> to vector<16x128xf32>
    %26 = arith.mulf %25, %23 : vector<16x128xf32>
    %c0_8 = arith.constant 0 : index
    %c0_9 = arith.constant 0 : index
    %27 = vector.load %arg3[%c0_8, %c0_9] : memref<1x128xf32, #tpu.memory_space<vmem>>, vector<1x128xf32>
    %28 = vector.broadcast %27 : vector<1x128xf32> to vector<16x128xf32>
    %29 = arith.addf %26, %28 : vector<16x128xf32>
    %c0_10 = arith.constant 0 : index
    %c0_11 = arith.constant 0 : index
    %30 = vector.load %arg4[%c0_10, %c0_11] : memref<16x128xf32, #tpu.memory_space<vmem>>, vector<16x128xf32>
    tpu.vector_store %arg4[%c0_10, %c0_11], %29 {strides = array<i32>} : memref<16x128xf32, #tpu.memory_space<vmem>>, vector<16x128xf32>,
    return
  }
  func.func @transform_0(%arg0: i32) -> (i32, i32) {
    %c0_i32 = arith.constant 0 : i32
    %c0_i32_0 = arith.constant 0 : i32
    return %arg0, %c0_i32 : i32, i32
  }
  func.func @transform_1(%arg0: i32) -> (i32, i32) {
    %c0_i32 = arith.constant 0 : i32
    %c0_i32_0 = arith.constant 0 : i32
    %c0_i32_1 = arith.constant 0 : i32
    return %c0_i32, %c0_i32_0 : i32, i32
  }
  func.func @transform_2(%arg0: i32) -> (i32, i32) {
    %c0_i32 = arith.constant 0 : i32
    %c0_i32_0 = arith.constant 0 : i32
    %c0_i32_1 = arith.constant 0 : i32
    return %c0_i32, %c0_i32_0 : i32, i32
  }
  func.func @transform_3(%arg0: i32) -> (i32, i32) {
    %c0_i32 = arith.constant 0 : i32
    %c0_i32_0 = arith.constant 0 : i32
    return %arg0, %c0_i32 : i32, i32
  }
}

</mosaic_0001>

<bundles_post_ra>
// kernel: tpu_custom_call.1
= control target key start
LH: loop header
LB: loop body
LE: loop exit
PB: predicated region body
PF: predicated region fallthrough
CT: control target
= control target key end

     0   :  { %8 = vsyncpa [#allocation3], 0  ;;  %s215_s0 = inlined_call_operand.hbm [shape: f32[16,128], index: 0, kind: input, shape index: {}]   ;;  %s216_s1 = inlined_call_operand.vmem [shape: f32[1,128], index: 1, kind: input, shape index: {}]   ;;  %s217_s2 = inlined_call_operand.vmem [shape: f32[1,128], index: 2, kind: input, shape index: {}]   ;;  %s218_s3 = inlined_call_operand.hbm [shape: f32[16,128], index: 3, kind: output, shape index: {}]  }
   0x1   :  { %9 = vsyncpa [#allocation4], 0  ;;  %s155_s12 = smov [#allocation2]   ;;  %s107_s16 = scalar_lea.hbm %s215_s0, 256 }
   0x2   :  { %s15_s13 = sshll.u32 %s155_s12, 4  ;;  %p108_p0 = scmp.ne.s32.totalorder %s215_s0, %s107_s16  ;;  %s16_s13 = int_to_ptr.vmem [resolvable:$true] %s15_s13 }
   0x3   :  { %p111_p1 = scmp.lt.u32.totalorder %s107_s16, %s215_s0 }
   0x5   :  { %p113_p2 = pnand %p111_p1, %p108_p0 }
   0x7   :  { %116 = shalt.err (!%p113_p2)
}
   0x8   :  { %s117_s21 = scalar_lea.vmem %s16_s13, 256  ;;  %p122_p4 = scmp.lt.s32.totalorder %s16_s13, %s16_s13 }
   0x9   :  { %p118_p3 = scmp.ne.s32.totalorder %s16_s13, %s117_s21  ;;  %p123_p5 = scmp.lt.s32.totalorder %s117_s21, %s117_s21 }
   0xb   :  { %p124_p6 = por %p123_p5, %p122_p4 }
   0xd   :  { %p125_p7 = pnand %p124_p6, %p118_p3 }
   0xf   :  { %128 = shalt.err (!%p125_p7)
}
  0x10   :  { %s156_s22 = smov 128   ;;  %s157_s23 = smov 8  }
  0x11   :  { %21 = dma.hbm_to_vmem [thread:$0]  %s215_s0, 256, %s16_s13, [#allocation3], %s156_s22, %s156_s22, %s157_s23  }
  0x12   :  { %151 = dma.done.wait [#allocation3], 256  }
  0x13   :  { %152 = vsyncadd [#allocation3], 4294967040  ;;  %v29_v0 = vld [vmem:[#allocation2] sm:$0xff]  ;;  %v30_v1 = vld [vmem:[#allocation2 + $0x8] sm:$0xff]  ;;  %v39_v2 = vlaneseq  ;;  %s158_s29 = smov [#allocation5]  }
  0x14   :  { %31 = vadd.xlane.f32.xlu0 %v29_v0  ;;  %v97_v21 = vld [vmem:[%s216_s1] ss:$0 sm:$0xff]  ;;  %s85_s30 = sshll.u32 %s158_s29, 4  ;;  %s86_s30 = int_to_ptr.vmem [resolvable:$true] %s85_s30 }
  0x15   :  { %v40_v3 = vand.u32 127, %v39_v2  ;;  %v98_v23 = vld [vmem:[%s217_s2] ss:$0 sm:$0xff]  ;;  %s129_s4 = scalar_lea.vmem %s86_s30, 256  ;;  %p134_p9 = scmp.lt.s32.totalorder %s86_s30, %s86_s30 }
  0x16   :  { %p130_p8 = scmp.ne.s32.totalorder %s86_s30, %s129_s4  ;;  %p135_p10 = scmp.lt.s32.totalorder %s129_s4, %s129_s4 }
  0x17   :  { %vm41_vm0 = vcmp.lt.s32.totalorder %v40_v3, 32 }
  0x18   :  { %33 = vadd.xlane.f32.xlu0 %v30_v1  ;;  %p136_p11 = por %p135_p10, %p134_p9 }
  0x1a   :  { %p137_p12 = pnand %p136_p11, %p130_p8 }
  0xa1   :  { %v32_v4 = vpop.xlane.xlu0 %31 }
  0xa2   :  { %v35_v5 = vmul.f32 0.03125, %v32_v4 }
  0xa4   :  { %v37_v6 = vsub.f32 %v29_v0, %v35_v5 }
  0xa5   :  { %v34_v7 = vpop.xlane.xlu0 %33 }
  0xa6   :  { %v36_v8 = vmul.f32 0.03125, %v34_v7  ;;  %v44_v9 = vsel %vm41_vm0, %v37_v6, 0.0 }
  0xa7   :  { %v46_v10 = vmul.f32 %v44_v9, %v44_v9 }
  0xa8   :  { %v38_v11 = vsub.f32 %v30_v1, %v36_v8 }
  0xa9   :  { %48 = vadd.xlane.f32.xlu1 %v46_v10 }
  0xaa   :  { %v45_v12 = vsel %vm41_vm0, %v38_v11, 0.0 }
  0xab   :  { %v47_v13 = vmul.f32 %v45_v12, %v45_v12 }
  0xad   :  { %50 = vadd.xlane.f32.xlu1 %v47_v13 }
 0x136   :  { %v49_v14 = vpop.xlane.xlu1 %48 }
 0x137   :  { %v52_v15 = vmul.f32 0.03125, %v49_v14 }
 0x139   :  { %v54_v16 = vadd.f32 1e-12, %v52_v15 }
 0x13a   :  { %v51_v17 = vpop.xlane.xlu1 %50 }
 0x13b   :  { %103 = vrsqrt.f32 %v54_v16  ;;  %v53_v18 = vmul.f32 0.03125, %v51_v17 }
 0x13d   :  { %v55_v19 = vadd.f32 1e-12, %v53_v18 }
 0x13f   :  { %105 = vrsqrt.f32 %v55_v19 }
 0x145   :  { %v104_v20 = vpop.eup %103 }
 0x146   :  { %v58_v22 = vmul.f32 %v104_v20, %v37_v6 }
 0x148   :  { %v67_v24 = vmul.f32 %v97_v21, %v58_v22 }
 0x149   :  { %v106_v25 = vpop.eup %105 }
 0x14a   :  { %v59_v26 = vmul.f32 %v106_v25, %v38_v11  ;;  %v76_v27 = vadd.f32 %v98_v23, %v67_v24 }
 0x14c   :  { %v68_v28 = vmul.f32 %v97_v21, %v59_v26  ;;  %78 = vst [vmem:[#allocation5] sm:$0xff] %v76_v27 }
 0x14e   :  { %v77_v29 = vadd.f32 %v98_v23, %v68_v28 }
 0x150   :  { %79 = vst [vmem:[#allocation5 + $0x8] sm:$0xff] %v77_v29 }
 0x151   :  { %140 = shalt.err (!%p137_p12)
}
 0x152   :  { %s141_s5 = scalar_lea.hbm %s218_s3, 256 }
 0x153   :  { %p142_p13 = scmp.ne.s32.totalorder %s218_s3, %s141_s5  ;;  %p145_p0 = scmp.lt.u32.totalorder %s141_s5, %s218_s3 }
 0x155   :  { %p147_p1 = pnand %p145_p0, %p142_p13 }
 0x157   :  { %150 = shalt.err (!%p147_p1)
}
 0x158   :  { %91 = dma.vmem_to_hbm [thread:$0]  %s86_s30, 256, %s218_s3, [#allocation4], %s156_s22, %s156_s22, %s157_s23  }
 0x159   :  { %153 = dma.done.wait [#allocation4], 256  }
 0x15a   :  { %154 = vsyncadd [#allocation4], 4294967040 }
 0x15b   :  { %95 = vsyncpa [#allocation3], 1 }
 0x15c   :  { %96 = vsyncpa [#allocation4], 1 }

</bundles_post_ra>
